<compile_context>
chip_gen: v7x
topology: tpu7x:2x2x1
jax: 0.10.0
libtpu: 0.0.40
codegen_flags: <defaults>
</compile_context>

<pallas_src>
import functools
import math

import jax
import jax.numpy as jnp
import numpy as np
from jax.experimental import pallas as pl
from jax.experimental.pallas import tpu as pltpu


def _scale_shift_kernel(x_ref, w_ref, b_ref, o_ref):
    """mult == 1: y = w * x + b per row.  One VPU FMA, one full-tile store.

    x_ref: (R, TILE_L)   w_ref/b_ref: (R, 1) f32   o_ref: (R, TILE_L)
    """
    o_ref[...] = (x_ref[...] * w_ref[...] + b_ref[...]).astype(o_ref.dtype)


def _expand_matmul_kernel(x_ref, ew_ref, b_ref, o_ref):
    """mult > 1: y = EW @ x + b.

    EW is a (R_out, R_in) block-diagonal matrix with EW[o_row, c_row] = w[o] when the
    output row maps to that input row and 0 otherwise, so the MXU performs both the
    channel expansion and the per-output-channel scaling in a single op.

    x_ref: (R_in, TILE_L)   ew_ref: (R_out, R_in) f32
    b_ref: (R_out, 1) f32   o_ref: (R_out, TILE_L)
    """
    x = x_ref[...].astype(jnp.float32)
    y = jnp.dot(ew_ref[...], x, preferred_element_type=jnp.float32) + b_ref[...]
    o_ref[...] = y.astype(o_ref.dtype)


def pointwise_conv1d(x, weight, bias=None, *, stride=1, padding=0, dilation=1):
    """x: (N, C_in, L); weight: (C_out, 1, 1); bias: (C_out,) or None.

    Returns (N, C_out, L_out) with Conv1d(kernel_size=1, groups=C_in) semantics.
    """
    del dilation  # kernel_size == 1 -> dilation has no effect
    n, c_in, _ = x.shape
    c_out = int(weight.shape[0])
    assert c_out % c_in == 0, "groups=in_channels requires out_channels % in_channels == 0"
    mult = c_out // c_in

    # TODO(synk): fold padding/stride into the in-kernel block reads (strided pl.ds +
    # bias-only edge tiles under pl.when) to avoid this extra HBM copy when stride > 1
    # or padding > 0; the defaults (stride=1, padding=0) take the zero-copy path.
    if padding:
        x = jnp.pad(x, ((0, 0), (0, 0), (padding, padding)))
    if stride != 1:
        x = x[:, :, ::stride]
    l_out = x.shape[2]

    weight = weight.reshape(c_out).astype(jnp.float32)
    if bias is None:
        bias = jnp.zeros((c_out,), jnp.float32)
    bias = bias.reshape(c_out).astype(jnp.float32)

    itemsize = jnp.dtype(x.dtype).itemsize
    sublane = {4: 8, 2: 16, 1: 32}.get(itemsize, 8)

    # --- L tile: lane-dense multiple of 128 so output stores are unmasked vst -------
    if l_out >= 2048:
        tile_l = 2048
    elif l_out >= 1024:
        tile_l = 1024
    elif l_out >= 512:
        tile_l = 512
    else:
        tile_l = l_out            # full extent is always a legal block dim

    budget = 8 * 1024 * 1024      # double-buffered in+out per step (safe on v5e/v6e/v7x)
    ew_cap = 512 * 1024           # expansion matrix grows with b_tile^2 -> keep it small

    def ew_bytes(bt):
        return (bt * c_out) * (bt * c_in) * 4 if mult > 1 else 0

    def footprint(bt, tl):
        f = 2 * (c_in + c_out) * bt * tl * itemsize      # double-buffered x + y blocks
        f += 2 * ew_bytes(bt) + 2 * bt * c_out * 4       # VMEM-resident params (x2 conservative)
        return f

    # --- batch-row tile: fill whole sublane groups, then grow to amortize overhead --
    base = sublane // math.gcd(c_in, sublane)
    if base >= n:
        b_tile = n                                       # full extent -> always legal
    else:
        b_tile = base
        while (b_tile * 2 <= n
               and footprint(b_tile * 2, tile_l) <= budget
               and ew_bytes(b_tile * 2) <= ew_cap):
            b_tile *= 2
    # very large channel counts: shrink the L tile instead (stay a multiple of 128)
    while footprint(b_tile, tile_l) > budget and tile_l >= 256 and tile_l % 256 == 0:
        tile_l //= 2

    row_in = b_tile * c_in
    row_out = b_tile * c_out
    grid = (pl.cdiv(n, b_tile), pl.cdiv(l_out, tile_l))

    # --- free layout plumbing: flatten (N, C, L) -> (N*C, L) ------------------------
    x2 = x.reshape(n * c_in, l_out)
    b2 = jnp.tile(bias.reshape(c_out, 1), (b_tile, 1))               # (row_out, 1) f32

    if mult == 1:
        param = jnp.tile(weight.reshape(c_out, 1), (b_tile, 1))      # (row_out, 1) f32
        param_spec = pl.BlockSpec((row_out, 1), lambda i, j: (0, 0))
        kernel = _scale_shift_kernel
    else:
        # Block-diagonal scale-expansion matrix:
        #   EW[bb*C_out + o, bb*C_in + c] = weight[o] if c == o // mult else 0
        onehot = (jnp.arange(c_out)[:, None] // mult
                  == jnp.arange(c_in)[None, :]).astype(jnp.float32)  # (C_out, C_in)
        ew_single = onehot * weight.reshape(c_out, 1)
        param = jnp.kron(jnp.eye(b_tile, dtype=jnp.float32), ew_single)  # (row_out, row_in)
        param_spec = pl.BlockSpec((row_out, row_in), lambda i, j: (0, 0))
        kernel = _expand_matmul_kernel
        # TODO(synk): for very large grouped channel counts with mult > 1, tile the
        # channel axis too instead of one dense expansion matmul per step.

    out2 = pl.pallas_call(
        kernel,
        out_shape=jax.ShapeDtypeStruct((n * c_out, l_out), x.dtype),
        grid=grid,
        in_specs=[
            pl.BlockSpec((row_in, tile_l), lambda i, j: (i, j)),
            param_spec,
            pl.BlockSpec((row_out, 1), lambda i, j: (0, 0)),
        ],
        out_specs=pl.BlockSpec((row_out, tile_l), lambda i, j: (i, j)),
        compiler_params=pltpu.CompilerParams(
            dimension_semantics=("parallel", "parallel"),
            vmem_limit_bytes=32 * 1024 * 1024),
    )(x2, param, b2)
    return out2.reshape(n, c_out, l_out)


def _reference(x, weight, bias, mult):
    c_out = weight.shape[0]
    x_rep = jnp.repeat(x, mult, axis=1)
    return x_rep * weight.reshape(1, c_out, 1) + bias.reshape(1, c_out, 1)


if __name__ == "__main__":
    key = jax.random.PRNGKey(0)
    kx, kw, kb = jax.random.split(key, 3)

    # Generic grouped case with channel multiplier (C_out = 2 * C_in).
    N, C_IN, C_OUT, L = 2, 4, 8, 16
    x = jax.random.normal(kx, (N, C_IN, L), dtype=jnp.float32)
    # Conv1d weight with groups=C_in: (C_out, C_in/groups=1, k=1); bias (C_out,).
    weight = jax.random.normal(kw, (C_OUT, 1, 1), dtype=jnp.float32) * 0.5
    bias = jax.random.normal(kb, (C_OUT,), dtype=jnp.float32) * 0.1

    out = jax.block_until_ready(pointwise_conv1d(x, weight, bias))
    ref = _reference(x, weight, bias, C_OUT // C_IN)
    np.testing.assert_allclose(np.asarray(out), np.asarray(ref), rtol=1e-6, atol=1e-6)

    # mult == 1 case (C_out == C_in): pure per-channel scale + shift path.
    w1, b1 = weight[:C_IN], bias[:C_IN]
    out1 = jax.block_until_ready(pointwise_conv1d(x, w1, b1))
    ref1 = _reference(x, w1, b1, 1)
    np.testing.assert_allclose(np.asarray(out1), np.asarray(ref1), rtol=1e-6, atol=1e-6)

    print("KERNEL_OK")
</pallas_src>

<mosaic_0001>
module attributes {stable_mosaic.version = 11 : i64} {
  func.func @_expand_matmul_kernel(%arg0: i32, %arg1: i32, %arg2: memref<8x16xf32, #tpu.memory_space<vmem>>, %arg3: memref<16x8xf32, #tpu.memory_space<vmem>>, %arg4: memref<16x1xf32, #tpu.memory_space<vmem>>, %arg5: memref<16x16xf32, #tpu.memory_space<vmem>>) attributes {dimension_semantics = [#tpu.dimension_semantics<parallel>, #tpu.dimension_semantics<parallel>], iteration_bounds = array<i64: 1, 1>, scalar_prefetch = 0 : i64, scratch_operands = 0 : i64, tpu.core_type = #tpu.core_type<tc>, window_params = [{transform_indices = @transform_0, window_bounds = array<i64: 8, 16>}, {pipeline_mode = #tpu.pipeline_mode<synchronous>, transform_indices = @transform_1, window_bounds = array<i64: 16, 8>}, {pipeline_mode = #tpu.pipeline_mode<synchronous>, transform_indices = @transform_2, window_bounds = array<i64: 16, 1>}, {transform_indices = @transform_3, window_bounds = array<i64: 16, 16>}]} {
    %c0 = arith.constant 0 : index
    %c0_0 = arith.constant 0 : index
    %0 = vector.load %arg2[%c0, %c0_0] : memref<8x16xf32, #tpu.memory_space<vmem>>, vector<8x16xf32>
    %c0_1 = arith.constant 0 : index
    %c0_2 = arith.constant 0 : index
    %1 = vector.load %arg3[%c0_1, %c0_2] : memref<16x8xf32, #tpu.memory_space<vmem>>, vector<16x8xf32>
    %cst = arith.constant dense<0.000000e+00> : vector<16x16xf32>
    %2 = tpu.matmul %1, %0, %cst {dimension_numbers = #tpu.dot_dimension_numbers<[1], [0], [0], [1], [0, 0, 1, 1], [], []>} : vector<16x8xf32>, vector<8x16xf32>, vector<16x16xf32> -> vector<16x16xf32>
    %c0_3 = arith.constant 0 : index
    %c0_4 = arith.constant 0 : index
    %3 = vector.load %arg4[%c0_3, %c0_4] : memref<16x1xf32, #tpu.memory_space<vmem>>, vector<16x1xf32>
    %4 = vector.broadcast %3 : vector<16x1xf32> to vector<16x16xf32>
    %5 = arith.addf %2, %4 : vector<16x16xf32>
    %c0_5 = arith.constant 0 : index
    %c0_6 = arith.constant 0 : index
    %6 = vector.load %arg5[%c0_5, %c0_6] : memref<16x16xf32, #tpu.memory_space<vmem>>, vector<16x16xf32>
    tpu.vector_store %arg5[%c0_5, %c0_6], %5 {strides = array<i32>} : memref<16x16xf32, #tpu.memory_space<vmem>>, vector<16x16xf32>,
    return
  }
  func.func @transform_0(%arg0: i32, %arg1: i32) -> (i32, i32) {
    %c0_i32 = arith.constant 0 : i32
    return %arg0, %arg1 : i32, i32
  }
  func.func @transform_1(%arg0: i32, %arg1: i32) -> (i32, i32) {
    %c0_i32 = arith.constant 0 : i32
    %c0_i32_0 = arith.constant 0 : i32
    %c0_i32_1 = arith.constant 0 : i32
    return %c0_i32, %c0_i32_0 : i32, i32
  }
  func.func @transform_2(%arg0: i32, %arg1: i32) -> (i32, i32) {
    %c0_i32 = arith.constant 0 : i32
    %c0_i32_0 = arith.constant 0 : i32
    %c0_i32_1 = arith.constant 0 : i32
    return %c0_i32, %c0_i32_0 : i32, i32
  }
  func.func @transform_3(%arg0: i32, %arg1: i32) -> (i32, i32) {
    %c0_i32 = arith.constant 0 : i32
    return %arg0, %arg1 : i32, i32
  }
}

</mosaic_0001>

<bundles_post_ra>
// kernel: tpu_custom_call.1
= control target key start
LH: loop header
LB: loop body
LE: loop exit
PB: predicated region body
PF: predicated region fallthrough
CT: control target
= control target key end

     0   :  { %vm30_vm0 = vcmask 64512   ;;  %s221_s0 = inlined_call_operand.vmem [shape: f32[8,16], index: 0, kind: input, shape index: {}]   ;;  %s222_s1 = inlined_call_operand.vmem [shape: f32[16,8], index: 1, kind: input, shape index: {}]   ;;  %s223_s2 = inlined_call_operand.vmem [shape: f32[16,1], index: 2, kind: input, shape index: {}]   ;;  %s224_s3 = inlined_call_operand.hbm [shape: f32[16,16], index: 3, kind: output, shape index: {}]  }
   0x1   :  { %v15_v0 = vld [vmem:[%s221_s0] sm:$0xff]  ;;  %v17_v2 = vld [vmem:[%s222_s1 + $0x8] sm:$0xff] }
   0x2   :  { %v16_v1 = vld [vmem:[%s222_s1] sm:$0xff]  ;;  %136 = vmatprep.subr.mxu0 %v15_v0 }
   0x3   :  { %138 = vmatprep.mubr.msk.f32.mxu0 %vm30_vm0, %v16_v1  ;;  %v18_v3 = vld [vmem:[%s223_s2] sm:$0xff] }
   0x4   :  { %8 = vsyncpa [#allocation3], 0  ;;  %137 = vmatpush3.msra.mxu0 %v15_v0  ;;  %v170_v4 = vmov 0   ;;  %v19_v5 = vld [vmem:[%s223_s2 + $0x8] sm:$0xff]  ;;  %s171_s21 = smov [#allocation2]   ;;  %vm112_vm1 = vcmask 130048  }
   0x5   :  { %145 = vset.pattern.permute.xlu0 %v170_v4  ;;  %139 = vmatmul.mubr.msk.f32.vlgmr.msra.gmra.mrb[0].mxu0 %vm30_vm0, %v17_v2  ;;  %s120_s1 = sshll.u32 %s171_s21, 4  ;;  %s121_s1 = int_to_ptr.vmem [resolvable:$true] %s120_s1 }
   0x6   :  { %22 = vperm.xlu0 %145, %v18_v3   ;;  %s146_s22 = scalar_lea.vmem %s121_s1, 256  ;;  %p151_p1 = scmp.lt.s32.totalorder %s121_s1, %s121_s1 }
   0x7   :  { %p147_p0 = scmp.ne.s32.totalorder %s121_s1, %s146_s22  ;;  %p152_p2 = scmp.lt.s32.totalorder %s146_s22, %s146_s22 }
   0x9   :  { %p153_p3 = por %p152_p2, %p151_p1 }
   0xa   :  { %27 = vperm.xlu0 %145, %v19_v5  }
   0xb   :  { %p154_p4 = pnand %p153_p3, %p147_p0 }
  0x85   :  { %v23_v6 = vpop.permute.xlu0 %22 }
  0x89   :  { %v28_v7 = vpop.permute.xlu0 %27 }
  0xd8   :  { %v140_v8 = vpop.f32.mrb[0].mxu0 }
  0xd9   :  { %v109_v9 = vadd.f32 %v140_v8, %v28_v7  ;;  %v103_v10 = vpop.f32.mrb[1].mxu0 }
  0xda   :  { %v104_v11 = vadd.f32 %v103_v10, %v23_v6 }
  0xdb   :  { %114 = vst.msk [vmem:[#allocation2 + $0x8] sm:$0xff] %vm112_vm1, %v109_v9 }
  0xdc   :  { %113 = vst.msk [vmem:[#allocation2] sm:$0xff] %vm112_vm1, %v104_v11 }
  0xdd   :  { %157 = shalt.err (!%p154_p4)
}
  0xde   :  { %s158_s24 = scalar_lea.hbm %s224_s3, 256 }
  0xdf   :  { %p159_p5 = scmp.ne.s32.totalorder %s224_s3, %s158_s24  ;;  %p162_p6 = scmp.lt.u32.totalorder %s158_s24, %s224_s3 }
  0xe1   :  { %p164_p7 = pnand %p162_p6, %p159_p5 }
  0xe3   :  { %167 = shalt.err (!%p164_p7)
}
  0xe4   :  { %s172_s29 = smov 128   ;;  %s173_s30 = smov 8  }
  0xe5   :  { %126 = dma.vmem_to_hbm [thread:$0]  %s121_s1, 256, %s224_s3, [#allocation3], %s172_s29, %s172_s29, %s173_s30  }
  0xe6   :  { %168 = dma.done.wait [#allocation3], 256  }
  0xe7   :  { %169 = vsyncadd [#allocation3], 4294967040 }
  0xe8   :  { %130 = vsyncpa [#allocation3], 1 }

</bundles_post_ra>
